<compile_context>
chip_gen: v6e
topology: v6e:2x2x1
jax: 0.10.0
libtpu: 0.0.40
codegen_flags: <defaults>
</compile_context>

<pallas_src>
import jax
import jax.numpy as jnp
from jax import lax
from jax.experimental import pallas as pl
from jax.experimental.pallas import tpu as pltpu


def _round_up(a, b):
    return -(-a // b) * b


def adv_mlp_kernel(x_ref, w1_ref, b1_ref, w2_ref, b2_ref, o_ref):
    x = x_ref[...]                                        # (tile_n, H), native dtype
    # Layer 1: x @ W1.T  (W1 kept in torch layout (out, in)); f32 MXU accumulate.
    h = lax.dot_general(
        x, w1_ref[...],
        dimension_numbers=(((1,), (1,)), ((), ())),
        preferred_element_type=jnp.float32)               # (tile_n, H) f32
    h = jnp.maximum(h + b1_ref[...], 0.0)                 # bias + ReLU (VPU)
    # Layer 2 in transposed orientation -> lane-dense (dim_out, tile_n) result.
    # Cast h to the weight dtype so a bf16 W2 hits the bf16 MXU path (no-op for f32).
    y = lax.dot_general(
        w2_ref[...], h.astype(w2_ref.dtype),
        dimension_numbers=(((1,), (1,)), ((), ())),
        preferred_element_type=jnp.float32)               # (dim_out, tile_n) f32
    o_ref[...] = (y + b2_ref[...]).astype(o_ref.dtype)


def adversarial_network_forward(x, w1, b1, w2, b2, *, tile_n=4096):
    """x: (N, H); w1: (H, H) torch layout (out, in); b1: (H,);
       w2: (dim_out, H) torch layout; b2: (dim_out,). Returns logits (N, dim_out)."""
    n, h_in = x.shape
    h_out = w1.shape[0]
    dim_out = w2.shape[0]

    # Row-tile selection (no padding; Pallas handles the ragged last block).
    if n <= 1024:
        # Small N: one full-extent tile (block dims == array dims, so no (8,128)
        # divisibility requirement applies).
        tile_n = n
    else:
        # Large N: keep tile_n a multiple of 128 (lane-dense, unmasked output
        # stores) and guarantee >= 4 grid steps so the "parallel" N axis shards
        # across both v7x TensorCores (v5e/v6e simply get fewer, fatter steps).
        cap = max(128, _round_up(pl.cdiv(n, 4), 128))
        tile_n = max(128, (min(tile_n, cap) // 128) * 128)

    grid = (pl.cdiv(n, tile_n),)

    b1_r = b1.reshape(1, h_out)
    b2_r = b2.reshape(dim_out, 1)   # broadcasts over the lane (N) axis in-kernel

    out_t = pl.pallas_call(
        adv_mlp_kernel,
        out_shape=jax.ShapeDtypeStruct((dim_out, n), x.dtype),
        grid_spec=pltpu.PrefetchScalarGridSpec(
            num_scalar_prefetch=0,
            grid=grid,
            in_specs=[
                pl.BlockSpec((tile_n, h_in), lambda i: (i, 0)),   # x tile
                pl.BlockSpec((h_out, h_in), lambda i: (0, 0)),    # W1 (VMEM-resident)
                pl.BlockSpec((1, h_out), lambda i: (0, 0)),       # b1 (resident)
                pl.BlockSpec((dim_out, h_in), lambda i: (0, 0)),  # W2 (resident)
                pl.BlockSpec((dim_out, 1), lambda i: (0, 0)),     # b2 (resident)
            ],
            out_specs=pl.BlockSpec((dim_out, tile_n), lambda i: (0, i)),
        ),
        compiler_params=pltpu.CompilerParams(
            dimension_semantics=("parallel",)),
    )(x, w1, b1_r, w2, b2_r)

    if dim_out == 1:
        return out_t.reshape(n, 1)           # free reshape (same row-major layout)
    return out_t.T                           # small transpose for multi-class heads


def _xavier_normal(key, shape):
    # torch.nn.init.xavier_normal_: std = sqrt(2 / (fan_in + fan_out)), shape=(out, in)
    fan_out, fan_in = shape
    std = (2.0 / (fan_in + fan_out)) ** 0.5
    return std * jax.random.normal(key, shape, dtype=jnp.float32)


if __name__ == "__main__":
    # TODO(synk): grl_hook (gradient reversal) is backward-only; forward is identity.
    # Shapes consistent with the module: hidden2 = 32, binary sensitive attribute
    # -> dim_out = 1.
    N = 8          # number of nodes / samples
    H = 32         # args.hidden2 (in_feature == hidden_size)
    DIM_OUT = 1    # binary adversary head

    key = jax.random.PRNGKey(0)
    kx, kw1, kw2, kx2 = jax.random.split(key, 4)

    x = jax.random.normal(kx, (N, H), dtype=jnp.float32)

    # Deterministic parameter init matching the module's __init__:
    #   xavier_normal_ on weights, constant 0.1 on biases.
    w1 = _xavier_normal(kw1, (H, H))           # ad_layer1.weight (out, in)
    b1 = jnp.full((H,), 0.1, dtype=jnp.float32)
    w2 = _xavier_normal(kw2, (DIM_OUT, H))     # ad_layer2.weight (out, in)
    b2 = jnp.full((DIM_OUT,), 0.1, dtype=jnp.float32)

    def ref_fwd(xx):
        return jnp.maximum(xx @ w1.T + b1, 0.0) @ w2.T + b2

    # 1) Small-shape case (single full-extent tile, grid=(1,)).
    out = adversarial_network_forward(x, w1, b1, w2, b2)
    out = jax.block_until_ready(out)
    assert out.shape == (N, DIM_OUT), out.shape
    assert jnp.allclose(out, ref_fwd(x), atol=1e-5, rtol=1e-5), "mismatch (small N)"

    # 2) Larger N, not a multiple of the tile -> ragged multi-step grid (no padding).
    N2 = 3000
    x2 = jax.random.normal(kx2, (N2, H), dtype=jnp.float32)
    out2 = adversarial_network_forward(x2, w1, b1, w2, b2)
    out2 = jax.block_until_ready(out2)
    assert out2.shape == (N2, DIM_OUT), out2.shape
    assert jnp.allclose(out2, ref_fwd(x2), atol=1e-5, rtol=1e-5), "mismatch (tiled N)"

    # 3) bf16 inputs (halves HBM traffic); f32 MXU accumulation inside the kernel.
    #    Loose tolerance: inputs and output logits are bf16.
    x2_bf = x2.astype(jnp.bfloat16)
    w1_bf = w1.astype(jnp.bfloat16)
    w2_bf = w2.astype(jnp.bfloat16)
    out3 = adversarial_network_forward(x2_bf, w1_bf, b1, w2_bf, b2)
    out3 = jax.block_until_ready(out3)
    assert out3.shape == (N2, DIM_OUT), out3.shape
    assert bool(jnp.all(jnp.isfinite(out3.astype(jnp.float32)))), "non-finite (bf16)"
    assert jnp.allclose(out3.astype(jnp.float32), ref_fwd(x2), atol=1e-1, rtol=1e-1), \
        "mismatch (bf16)"

    print("KERNEL_OK")
</pallas_src>

<mosaic_0001>
module attributes {stable_mosaic.version = 11 : i64} {
  func.func @adv_mlp_kernel(%arg0: i32, %arg1: memref<8x32xf32, #tpu.memory_space<vmem>>, %arg2: memref<32x32xf32, #tpu.memory_space<vmem>>, %arg3: memref<1x32xf32, #tpu.memory_space<vmem>>, %arg4: memref<1x32xf32, #tpu.memory_space<vmem>>, %arg5: memref<1x1xf32, #tpu.memory_space<vmem>>, %arg6: memref<1x8xf32, #tpu.memory_space<vmem>>) attributes {dimension_semantics = [#tpu.dimension_semantics<parallel>], iteration_bounds = array<i64: 1>, scalar_prefetch = 0 : i64, scratch_operands = 0 : i64, tpu.core_type = #tpu.core_type<tc>, window_params = [{transform_indices = @transform_0, window_bounds = array<i64: 8, 32>}, {pipeline_mode = #tpu.pipeline_mode<synchronous>, transform_indices = @transform_1, window_bounds = array<i64: 32, 32>}, {pipeline_mode = #tpu.pipeline_mode<synchronous>, transform_indices = @transform_2, window_bounds = array<i64: 1, 32>}, {pipeline_mode = #tpu.pipeline_mode<synchronous>, transform_indices = @transform_3, window_bounds = array<i64: 1, 32>}, {pipeline_mode = #tpu.pipeline_mode<synchronous>, transform_indices = @transform_4, window_bounds = array<i64: 1, 1>}, {transform_indices = @transform_5, window_bounds = array<i64: 1, 8>}]} {
    %c0 = arith.constant 0 : index
    %c0_0 = arith.constant 0 : index
    %0 = vector.load %arg1[%c0, %c0_0] : memref<8x32xf32, #tpu.memory_space<vmem>>, vector<8x32xf32>
    %c0_1 = arith.constant 0 : index
    %c0_2 = arith.constant 0 : index
    %1 = vector.load %arg2[%c0_1, %c0_2] : memref<32x32xf32, #tpu.memory_space<vmem>>, vector<32x32xf32>
    %cst = arith.constant dense<0.000000e+00> : vector<8x32xf32>
    %2 = tpu.matmul %0, %1, %cst {dimension_numbers = #tpu.dot_dimension_numbers<[1], [1], [0], [0], [0, 0, 1, 0], [], []>} : vector<8x32xf32>, vector<32x32xf32>, vector<8x32xf32> -> vector<8x32xf32>
    %c0_3 = arith.constant 0 : index
    %c0_4 = arith.constant 0 : index
    %3 = vector.load %arg3[%c0_3, %c0_4] : memref<1x32xf32, #tpu.memory_space<vmem>>, vector<1x32xf32>
    %4 = vector.broadcast %3 : vector<1x32xf32> to vector<8x32xf32>
    %5 = arith.addf %2, %4 : vector<8x32xf32>
    %cst_5 = arith.constant 0.000000e+00 : f32
    %6 = vector.broadcast %cst_5 : f32 to vector<8x32xf32>
    %7 = arith.maximumf %5, %6 : vector<8x32xf32>
    %c0_6 = arith.constant 0 : index
    %c0_7 = arith.constant 0 : index
    %8 = vector.load %arg4[%c0_6, %c0_7] : memref<1x32xf32, #tpu.memory_space<vmem>>, vector<1x32xf32>
    %cst_8 = arith.constant dense<0.000000e+00> : vector<1x8xf32>
    %9 = tpu.matmul %8, %7, %cst_8 {dimension_numbers = #tpu.dot_dimension_numbers<[1], [1], [0], [0], [0, 0, 1, 0], [], []>} : vector<1x32xf32>, vector<8x32xf32>, vector<1x8xf32> -> vector<1x8xf32>
    %c0_9 = arith.constant 0 : index
    %c0_10 = arith.constant 0 : index
    %10 = vector.load %arg5[%c0_9, %c0_10] : memref<1x1xf32, #tpu.memory_space<vmem>>, vector<1x1xf32>
    %11 = vector.broadcast %10 : vector<1x1xf32> to vector<1x8xf32>
    %12 = arith.addf %9, %11 : vector<1x8xf32>
    %c0_11 = arith.constant 0 : index
    %c0_12 = arith.constant 0 : index
    %13 = vector.load %arg6[%c0_11, %c0_12] : memref<1x8xf32, #tpu.memory_space<vmem>>, vector<1x8xf32>
    tpu.vector_store %arg6[%c0_11, %c0_12], %12 {strides = array<i32>} : memref<1x8xf32, #tpu.memory_space<vmem>>, vector<1x8xf32>,
    return
  }
  func.func @transform_0(%arg0: i32) -> (i32, i32) {
    %c0_i32 = arith.constant 0 : i32
    %c0_i32_0 = arith.constant 0 : i32
    return %arg0, %c0_i32 : i32, i32
  }
  func.func @transform_1(%arg0: i32) -> (i32, i32) {
    %c0_i32 = arith.constant 0 : i32
    %c0_i32_0 = arith.constant 0 : i32
    %c0_i32_1 = arith.constant 0 : i32
    return %c0_i32, %c0_i32_0 : i32, i32
  }
  func.func @transform_2(%arg0: i32) -> (i32, i32) {
    %c0_i32 = arith.constant 0 : i32
    %c0_i32_0 = arith.constant 0 : i32
    %c0_i32_1 = arith.constant 0 : i32
    return %c0_i32, %c0_i32_0 : i32, i32
  }
  func.func @transform_3(%arg0: i32) -> (i32, i32) {
    %c0_i32 = arith.constant 0 : i32
    %c0_i32_0 = arith.constant 0 : i32
    %c0_i32_1 = arith.constant 0 : i32
    return %c0_i32, %c0_i32_0 : i32, i32
  }
  func.func @transform_4(%arg0: i32) -> (i32, i32) {
    %c0_i32 = arith.constant 0 : i32
    %c0_i32_0 = arith.constant 0 : i32
    %c0_i32_1 = arith.constant 0 : i32
    return %c0_i32, %c0_i32_0 : i32, i32
  }
  func.func @transform_5(%arg0: i32) -> (i32, i32) {
    %c0_i32 = arith.constant 0 : i32
    %c0_i32_0 = arith.constant 0 : i32
    return %c0_i32, %arg0 : i32, i32
  }
}

</mosaic_0001>

<bundles_post_ra>
// kernel: tpu_custom_call.1
= control target key start
LH: loop header
LB: loop body
LE: loop exit
PB: predicated region body
PF: predicated region fallthrough
CT: control target
= control target key end

     0   :  { %s422_s0 = inlined_call_operand.hbm [shape: f32[8,32], index: 0, kind: input, shape index: {}]   ;;  %s423_s1 = inlined_call_operand.hbm [shape: f32[32,32], index: 1, kind: input, shape index: {}]   ;;  %s424_s2 = inlined_call_operand.vmem [shape: f32[1,32], index: 2, kind: input, shape index: {}]   ;;  %s425_s3 = inlined_call_operand.vmem [shape: f32[1,32], index: 3, kind: input, shape index: {}]   ;;  %s426_s4 = inlined_call_operand.<no memory space> [shape: f32[1,1], index: 4, kind: input, shape index: {}]   ;;  %s427_s5 = inlined_call_operand.hbm [shape: f32[1,8], index: 5, kind: output, shape index: {}]  }
   0x1   :  { %v10_v0 = vstv %s426_s4 }
   0x2   :  { %11 = vst [vmem:[#allocation2] sm:$0x1] %v10_v0 }
   0x3   :  { %12 = vsyncpa [#allocation4], 0 }
   0x4   :  { %13 = vsyncpa [#allocation7], 0 }
   0x5   :  { %14 = vsyncpa [#allocation5], 0  ;;  %s359_s20 = smov [#allocation3]   ;;  %s360_s22 = smov [#allocation6]  }
   0x6   :  { %s21_s21 = sshll.u32 %s359_s20, 4  ;;  %s30_s23 = sshll.u32 %s360_s22, 4  ;;  %s22_s21 = int_to_ptr.vmem [resolvable:$true] %s21_s21  ;;  %s31_s23 = int_to_ptr.vmem [resolvable:$true] %s30_s23 }
   0x7   :  { %s301_s24 = scalar_lea.vmem %s22_s21, 128  ;;  %p306_p1 = scmp.lt.s32.totalorder %s22_s21, %s22_s21 }
   0x8   :  { %p302_p0 = scmp.ne.s32.totalorder %s22_s21, %s301_s24  ;;  %p307_p2 = scmp.lt.s32.totalorder %s301_s24, %s301_s24 }
   0xa   :  { %p308_p3 = por %p307_p2, %p306_p1 }
   0xc   :  { %p309_p4 = pnand %p308_p3, %p302_p0 }
   0xe   :  { %312 = shalt.err (!%p309_p4)
}
   0xf   :  { %24 = dma.hbm_to_vmem [thread:$0]  %s422_s0, 128, %s22_s21, [#allocation4]  }
  0x10   :  { %s321_s4 = scalar_lea.vmem %s31_s23, 512  ;;  %p326_p6 = scmp.lt.s32.totalorder %s31_s23, %s31_s23 }
  0x11   :  { %p322_p5 = scmp.ne.s32.totalorder %s31_s23, %s321_s4  ;;  %p327_p7 = scmp.lt.s32.totalorder %s321_s4, %s321_s4 }
  0x13   :  { %p328_p8 = por %p327_p7, %p326_p6 }
  0x15   :  { %p329_p9 = pnand %p328_p8, %p322_p5 }
  0x17   :  { %332 = shalt.err (!%p329_p9)
}
  0x18   :  { %s361_s27 = smov 128   ;;  %s362_s28 = smov 8  }
  0x19   :  { %36 = dma.hbm_to_vmem [thread:$0]  %s423_s1, 512, %s31_s23, [#allocation7], %s361_s27, %s361_s27, %s362_s28  }
  0x1a   :  { %353 = dma.done.wait [#allocation4], 128  }
  0x1b   :  { %354 = vsyncadd [#allocation4], 4294967168 }
  0x1c   :  { %355 = dma.done.wait [#allocation7], 512  }
  0x1d   :  { %356 = vsyncadd [#allocation7], 4294966784  ;;  %v363_v1 = vmov 0.0   ;;  %vm364_vm0 = vmmov 0   ;;  %vm61_vm1 = vcmask 261120   ;;  %v53_v2 = vld [vmem:[#allocation6 + $0x18] sm:$0xff]  ;;  %v155_v15 = vlaneseq }
  0x1e   :  { %268 = vmatprep.subr.mxu0 %v363_v1  ;;  %276 = vmatprep.mubr.msk.f32.mxu0 %vm364_vm0, %v363_v1  ;;  %v52_v3 = vld [vmem:[#allocation6 + $0x10] sm:$0xff]  ;;  %v51_v4 = vld [vmem:[#allocation6 + $0x8] sm:$0xff]  ;;  %v50_v5 = vld [vmem:[#allocation6] sm:$0xff]  ;;  %v365_v8 = vmov 0   ;;  %s366_s8 = smov [#allocation8]   ;;  %vm235_vm2 = vcmask 57344  }
  0x1f   :  { %279 = vmatprep.subr.mxu1 %v363_v1  ;;  %281 = vmatprep.mubr.msk.f32.mxu1 %vm364_vm0, %v363_v1  ;;  %v49_v6 = vld [vmem:[#allocation3] sm:$0xff]  ;;  %v149_v7 = vld [vmem:[#allocation2] sm:$0x1]  ;;  %v156_v16 = vshrl.u32 %v155_v15, 7  ;;  %s243_s9 = sshll.u32 %s366_s8, 4  ;;  %s244_s9 = int_to_ptr.vmem [resolvable:$true] %s243_s9 }
  0x20   :  { %269 = vmatpush3.xpose.msk.msra.mxu0 %vm61_vm1, %v53_v2  ;;  %292 = vset.pattern.permute.xlu0 %v365_v8  ;;  %v253_v9 = vld [vmem:[%s424_s2] ss:$0 sm:$0xff]  ;;  %s333_s2 = scalar_lea.vmem %s244_s9, 16  ;;  %s337_s10 = scalar_lea.vmem %s244_s9, 32 }
  0x21   :  { %270 = vmatprep.subr.mxu0 %v363_v1  ;;  %152 = vperm.xlu0 %292, %v149_v7   ;;  %v148_v14 = vld [vmem:[%s425_s3] sm:$0x1]  ;;  %v157_v17 = vsub.s32 0, %v156_v16  ;;  %p334_p10 = scmp.ne.s32.totalorder %s244_s9, %s333_s2  ;;  %p338_p11 = scmp.lt.s32.totalorder %s244_s9, %s244_s9 }
  0x22   :  { %p339_p12 = scmp.lt.s32.totalorder %s337_s10, %s333_s2 }
  0x24   :  { %271 = vmatpush3.xpose.msk.msra.mxu0 %vm61_vm1, %v52_v3  ;;  %p340_p13 = por %p339_p12, %p338_p11 }
  0x25   :  { %272 = vmatprep.subr.mxu0 %v363_v1 }
  0x26   :  { %p341_p0 = pnand %p340_p13, %p334_p10 }
  0x28   :  { %273 = vmatpush3.xpose.msk.msra.mxu0 %vm61_vm1, %v51_v4 }
  0x29   :  { %274 = vmatprep.subr.mxu0 %v363_v1 }
  0x2c   :  { %275 = vmatpush3.xpose.msk.msra.mxu0 %vm61_vm1, %v50_v5 }
  0x2f   :  { %277 = vmatmul.mubr.msk.f32.vlgmr.msra.gmra.mxu0 %vm61_vm1, %v49_v6 }
  0x9c   :  { %v153_v18 = vpop.permute.xlu0 %152 }
  0x9d   :  { %v158_v19 = vrot.slane %v153_v18, %v157_v17 }
  0xef   :  { %v143_v10 = vpop.f32.mrf.mxu0 }
  0xf0   :  { %v144_v11 = vadd.f32 %v253_v9, %v143_v10 }
  0xf1   :  { %v278_v12 = vpop.f32.mrf.mxu0 }
  0xf2   :  { %v147_v13 = vmax.f32 %v144_v11, 0.0 }
  0xf4   :  { %280 = vmatpush3.xpose.msk.msra.mxu1 %vm61_vm1, %v147_v13 }
  0xf7   :  { %282 = vmatmul.mubr.msk.f32.vlgmr.msra.gmra.mxu1 %vm61_vm1, %v148_v14 }
 0x1b7   :  { %v231_v20 = vpop.f32.mrf.mxu1 }
 0x1b8   :  { %v232_v21 = vadd.f32 %v231_v20, %v158_v19 }
 0x1b9   :  { %v283_v22 = vpop.f32.mrf.mxu1 }
 0x1ba   :  { %236 = vst.msk [vmem:[#allocation8] sm:$0x1] %vm235_vm2, %v232_v21 }
 0x1bb   :  { %344 = shalt.err (!%p341_p0)
}
 0x1bc   :  { %246 = dma.vmem_to_hbm [thread:$0]  %s244_s9, 16, %s427_s5, [#allocation5]  }
 0x1bd   :  { %357 = dma.done.wait [#allocation5], 16  }
 0x1be   :  { %358 = vsyncadd [#allocation5], 4294967280 }
 0x1bf   :  { %250 = vsyncpa [#allocation4], 1 }
 0x1c0   :  { %251 = vsyncpa [#allocation7], 1 }
 0x1c1   :  { %252 = vsyncpa [#allocation5], 1 }

</bundles_post_ra>
